<compile_context>
chip_gen: v5e
topology: v5e:2x2
jax: 0.10.0
libtpu: 0.0.40
codegen_flags: <defaults>
</compile_context>

<pallas_src>
import functools

import numpy as np
import jax
import jax.numpy as jnp
from jax import lax
from jax.experimental import pallas as pl
from jax.experimental.pallas import tpu as pltpu

_N_SHAPE_SLOTS = 5                          # max circles of the 'irregular' branch
_PARAMS_PER_IMG = 5 + 5 * _N_SHAPE_SLOTS    # 30 float32 scalars per image
_EMPTY = 1e9                                # degenerate rect bound (always-false test)

# Per-image parameter layout, params[i*30 + ...] (float32, SMEM, flat 1-D):
#   [0]           shadow_intensity
#   [1:5]         rectangle bounds ymin, ymax, xmin, xmax (inclusive);
#                 non-rect images get ymin=+1e9, ymax=-1e9 (empty rectangle)
#   [5+5k : 10+5k] slot k (only the first counts[i] slots are ever read):
#                 cx, cy, inv_a, inv_b, thresh
#       ellipse : inv_a = 1/(a+1e-6), inv_b = 1/(b+1e-6), thresh = 1
#       circle  : inv_a = inv_b = 1,                      thresh = radius**2
# counts[i] (int32, SMEM): number of active ellipse/circle slots (0 for rectangle).


def _shadow_kernel(counts_ref, params_ref, img_ref, out_ref, *,
                   imgs_per_block, tile_h, w, n_params):
    """One grid step == one H-tile of `imgs_per_block` images.

    counts_ref : SMEM (N,) int32        (scalar prefetch)
    params_ref : SMEM (N*30,) float32   (scalar prefetch)
    img_ref / out_ref : VMEM (imgs_per_block, C, tile_h, W), W lane-dense.
    """
    step = pl.program_id(0)
    h_off = pl.program_id(1) * tile_h  # scalar offset of this H-tile

    # Pixel coordinate planes for this tile (hoisted, shared by all images/slots).
    yy = (lax.broadcasted_iota(jnp.int32, (tile_h, w), 0) + h_off).astype(jnp.float32)
    xx = lax.broadcasted_iota(jnp.int32, (tile_h, w), 1).astype(jnp.float32)

    for j in range(imgs_per_block):  # small static unroll
        idx = step * imgs_per_block + j
        p0 = idx * n_params

        intensity = params_ref[p0 + 0]
        ymin = params_ref[p0 + 1]
        ymax = params_ref[p0 + 2]
        xmin = params_ref[p0 + 3]
        xmax = params_ref[p0 + 4]

        # Rectangle mask (inclusive bounds == torch's mask[y1:y2+1, x1:x2+1] = 1).
        # Non-rect images carry degenerate bounds -> all False.
        in_rect = (yy >= ymin) & (yy <= ymax) & (xx >= xmin) & (xx <= xmax)

        # Union of the image's *active* ellipse/circle slots via a running minimum
        # of the quadratic forms: inside iff min_k (dx^2 + dy^2 - thresh) <= 0.
        n_act = counts_ref[idx]

        def body(k, dmin, p0=p0):
            base = p0 + 5 + 5 * k
            cx = params_ref[base + 0]
            cy = params_ref[base + 1]
            inv_a = params_ref[base + 2]
            inv_b = params_ref[base + 3]
            thresh = params_ref[base + 4]
            dx = (xx - cx) * inv_a
            dy = (yy - cy) * inv_b
            return jnp.minimum(dmin, dx * dx + dy * dy - thresh)

        dmin = lax.fori_loop(0, n_act, body,
                             jnp.full((tile_h, w), jnp.inf, jnp.float32))

        mask = in_rect | (dmin <= 0.0)
        scale = jnp.where(mask, 1.0 - intensity, jnp.float32(1.0))

        # Fused lane-dense store over all channels: img * (1 - mask*intensity).
        out_ref[j] = (img_ref[j].astype(jnp.float32) * scale[None]).astype(out_ref.dtype)


def _choose_tiling(n, c, h, w, itemsize, target_bytes=4 << 20):
    """Pick (imgs_per_block, tile_h): ~target-sized blocks, grid >= 2 steps."""
    # TILE_H candidates: divisors of H that are multiples of 8 (plus H itself).
    th_cands = sorted({d for d in range(8, h + 1, 8) if h % d == 0} | {h})
    th = th_cands[0]
    for cand in th_cands:
        if c * cand * w * itemsize <= target_bytes:
            th = cand
    per_block = c * th * w * itemsize

    # Pack several small images per step only when H is untiled; keep >= 2 grid
    # steps so the parallel axes have work for both TensorCores on v7x.
    b = 1
    if th == h:
        for cand in range(1, n + 1):
            if n % cand:
                continue
            steps = (n // cand) * (h // th)
            if cand * per_block <= target_bytes and (steps >= 2 or cand == 1):
                b = cand
    return b, th


def synthetic_shadow(img, counts, params, *, target_bytes=4 << 20):
    """img: (N, C, H, W) or (C, H, W); counts: (N,) int32; params: (N*30,) float32."""
    squeeze = img.ndim == 3
    if squeeze:
        img = img[None]
    N, C, H, W = img.shape

    counts = jnp.asarray(counts, jnp.int32)
    params = jnp.asarray(params, jnp.float32).reshape(-1)
    assert counts.shape == (N,)
    assert params.shape == (N * _PARAMS_PER_IMG,)

    itemsize = jnp.dtype(img.dtype).itemsize
    B, TH = _choose_tiling(N, C, H, W, itemsize, target_bytes)
    grid = (N // B, H // TH)

    kernel = functools.partial(
        _shadow_kernel,
        imgs_per_block=B, tile_h=TH, w=W, n_params=_PARAMS_PER_IMG)

    # Double-buffered in + out blocks, with headroom; safe on all chips (v7x = 64 MiB).
    block_bytes = B * C * TH * W * itemsize
    vmem_limit = int(min(64 << 20, max(32 << 20, 4 * block_bytes + (4 << 20))))

    cost = pl.CostEstimate(
        flops=int(N * H * W * (12 + 9 * _N_SHAPE_SLOTS + C)),
        transcendentals=0,
        bytes_accessed=int(2 * N * C * H * W * itemsize + 4 * (params.size + counts.size)),
    )

    # TODO(synk): the torch op mutates img_batch in place; callers that do not
    # reuse the input could pass input_output_aliases={2: 0} to drop the extra
    # HBM output allocation.
    out = pl.pallas_call(
        kernel,
        out_shape=jax.ShapeDtypeStruct((N, C, H, W), img.dtype),
        grid_spec=pltpu.PrefetchScalarGridSpec(
            num_scalar_prefetch=2,
            grid=grid,
            in_specs=[pl.BlockSpec((B, C, TH, W), lambda i, t, cnt, prm: (i, 0, t, 0))],
            out_specs=pl.BlockSpec((B, C, TH, W), lambda i, t, cnt, prm: (i, 0, t, 0)),
        ),
        compiler_params=pltpu.CompilerParams(
            dimension_semantics=("parallel", "parallel"),
            vmem_limit_bytes=vmem_limit,
        ),
        cost_estimate=cost,
    )(counts, params, img)
    return out[0] if squeeze else out


def _sample_params(n, h, w, seed=0):
    """Host-side sampling of all Python `random` draws of the PyTorch module."""
    rng = np.random.default_rng(seed)
    counts = np.zeros((n,), np.int32)
    params = np.zeros((n, _PARAMS_PER_IMG), np.float32)
    params[:, 1] = _EMPTY   # ymin  \
    params[:, 2] = -_EMPTY  # ymax   } empty rectangle by default (non-rect images)
    params[:, 3] = _EMPTY   # xmin  /
    params[:, 4] = -_EMPTY  # xmax /
    for i in range(n):
        shadow_type = rng.choice(["ellipse", "rectangle", "irregular"])
        params[i, 0] = rng.uniform(0.3, 0.7)  # shadow_intensity
        if shadow_type == "rectangle":
            x1 = int(rng.integers(0, w // 2, endpoint=True))
            y1 = int(rng.integers(0, h // 2, endpoint=True))
            x2 = int(rng.integers(w // 2, w - 1, endpoint=True))
            y2 = int(rng.integers(h // 2, h - 1, endpoint=True))
            params[i, 1] = min(y1, y2)
            params[i, 2] = max(y1, y2)
            params[i, 3] = min(x1, x2)
            params[i, 4] = max(x1, x2)
        elif shadow_type == "ellipse":
            cx = int(rng.integers(w // 4, 3 * w // 4, endpoint=True))
            cy = int(rng.integers(h // 4, 3 * h // 4, endpoint=True))
            a = int(rng.integers(w // 8, w // 3, endpoint=True))
            b = int(rng.integers(h // 8, h // 3, endpoint=True))
            counts[i] = 1
            params[i, 5:10] = (cx, cy, 1.0 / (a + 1e-6), 1.0 / (b + 1e-6), 1.0)
        else:  # irregular: union of 2..5 circles
            n_circ = int(rng.integers(2, 5, endpoint=True))
            counts[i] = n_circ
            for k in range(n_circ):
                cx = int(rng.integers(0, w, endpoint=True))
                cy = int(rng.integers(0, h, endpoint=True))
                radius = int(rng.integers(min(h, w) // 10, min(h, w) // 3,
                                          endpoint=True))
                base = 5 + 5 * k
                params[i, base:base + 5] = (cx, cy, 1.0, 1.0, float(radius * radius))
    return jnp.asarray(counts), jnp.asarray(params.reshape(-1))


def _reference(img_np, counts_np, params_np):
    """Pure-numpy reference of mask construction + shadow application."""
    n, c, h, w = img_np.shape
    out = img_np.astype(np.float32).copy()
    yy, xx = np.meshgrid(np.arange(h, dtype=np.float32),
                         np.arange(w, dtype=np.float32), indexing="ij")
    p = np.asarray(params_np, np.float32).reshape(n, _PARAMS_PER_IMG)
    cnt = np.asarray(counts_np)
    for i in range(n):
        mask = ((yy >= p[i, 1]) & (yy <= p[i, 2]) &
                (xx >= p[i, 3]) & (xx <= p[i, 4]))
        for k in range(int(cnt[i])):
            base = 5 + 5 * k
            dx = (xx - p[i, base + 0]) * p[i, base + 2]
            dy = (yy - p[i, base + 1]) * p[i, base + 3]
            mask |= (dx * dx + dy * dy - p[i, base + 4]) <= 0.0
        scale = np.where(mask, np.float32(1.0) - p[i, 0], np.float32(1.0))
        out[i] = out[i] * scale
    return out


if __name__ == "__main__":
    key = jax.random.PRNGKey(0)
    # Small shapes consistent with the module's image inputs (W lane-dense).
    N, C, H, W = 2, 3, 16, 128
    img = jax.random.uniform(key, (N, C, H, W), dtype=jnp.float32)  # [0,1] images

    counts, params = _sample_params(N, H, W, seed=0)

    out = synthetic_shadow(img, counts, params)
    out = jax.block_until_ready(out)

    assert out.shape == (N, C, H, W)
    assert bool(jnp.all(jnp.isfinite(out)))

    ref = _reference(np.asarray(img), np.asarray(counts), np.asarray(params))
    np.testing.assert_allclose(np.asarray(out), ref, rtol=1e-5, atol=1e-5)

    print("KERNEL_OK")
</pallas_src>

<mosaic_0001>
module attributes {stable_mosaic.version = 11 : i64} {
  func.func @_shadow_kernel(%arg0: i32, %arg1: i32, %arg2: memref<2xi32, #tpu.memory_space<smem>>, %arg3: memref<60xf32, #tpu.memory_space<smem>>, %arg4: memref<1x3x16x128xf32, #tpu.memory_space<vmem>>, %arg5: memref<1x3x16x128xf32, #tpu.memory_space<vmem>>) attributes {dimension_semantics = [#tpu.dimension_semantics<parallel>, #tpu.dimension_semantics<parallel>], iteration_bounds = array<i64: 2, 1>, scalar_prefetch = 2 : i64, scratch_operands = 0 : i64, tpu.core_type = #tpu.core_type<tc>, window_params = [{transform_indices = @transform_0, window_bounds = array<i64: 1, 3, 16, 128>}, {transform_indices = @transform_1, window_bounds = array<i64: 1, 3, 16, 128>}]} {
    %c16_i32 = arith.constant 16 : i32
    %0 = arith.muli %arg1, %c16_i32 : i32
    %1 = tpu.iota {dimensions = array<i32: 0>} : vector<16x128xi32>
    %2 = vector.broadcast %0 : i32 to vector<16x128xi32>
    %3 = arith.addi %1, %2 : vector<16x128xi32>
    %4 = arith.sitofp %3 : vector<16x128xi32> to vector<16x128xf32>
    %5 = tpu.iota {dimensions = array<i32: 1>} : vector<16x128xi32>
    %6 = arith.sitofp %5 : vector<16x128xi32> to vector<16x128xf32>
    %c1_i32 = arith.constant 1 : i32
    %7 = arith.muli %arg0, %c1_i32 : i32
    %c0_i32 = arith.constant 0 : i32
    %8 = arith.addi %7, %c0_i32 : i32
    %c30_i32 = arith.constant 30 : i32
    %9 = arith.muli %8, %c30_i32 : i32
    %c0_i32_0 = arith.constant 0 : i32
    %10 = arith.addi %9, %c0_i32_0 : i32
    %11 = arith.index_cast %10 : i32 to index
    %12 = memref.load %arg3[%11] : memref<60xf32, #tpu.memory_space<smem>>
    %c1_i32_1 = arith.constant 1 : i32
    %13 = arith.addi %9, %c1_i32_1 : i32
    %14 = arith.index_cast %13 : i32 to index
    %15 = memref.load %arg3[%14] : memref<60xf32, #tpu.memory_space<smem>>
    %c2_i32 = arith.constant 2 : i32
    %16 = arith.addi %9, %c2_i32 : i32
    %17 = arith.index_cast %16 : i32 to index
    %18 = memref.load %arg3[%17] : memref<60xf32, #tpu.memory_space<smem>>
    %c3_i32 = arith.constant 3 : i32
    %19 = arith.addi %9, %c3_i32 : i32
    %20 = arith.index_cast %19 : i32 to index
    %21 = memref.load %arg3[%20] : memref<60xf32, #tpu.memory_space<smem>>
    %c4_i32 = arith.constant 4 : i32
    %22 = arith.addi %9, %c4_i32 : i32
    %23 = arith.index_cast %22 : i32 to index
    %24 = memref.load %arg3[%23] : memref<60xf32, #tpu.memory_space<smem>>
    %25 = vector.broadcast %15 : f32 to vector<16x128xf32>
    %26 = arith.cmpf oge, %4, %25 : vector<16x128xf32>
    %27 = vector.broadcast %18 : f32 to vector<16x128xf32>
    %28 = arith.cmpf ole, %4, %27 : vector<16x128xf32>
    %29 = arith.andi %26, %28 : vector<16x128xi1>
    %30 = vector.broadcast %21 : f32 to vector<16x128xf32>
    %31 = arith.cmpf oge, %6, %30 : vector<16x128xf32>
    %32 = arith.andi %29, %31 : vector<16x128xi1>
    %33 = vector.broadcast %24 : f32 to vector<16x128xf32>
    %34 = arith.cmpf ole, %6, %33 : vector<16x128xf32>
    %35 = arith.andi %32, %34 : vector<16x128xi1>
    %36 = arith.index_cast %8 : i32 to index
    %37 = memref.load %arg2[%36] : memref<2xi32, #tpu.memory_space<smem>>
    %cst = arith.constant 0x7F800000 : f32
    %38 = vector.broadcast %cst : f32 to vector<16x128xf32>
    %c0_i32_2 = arith.constant 0 : i32
    %39 = arith.subi %37, %c0_i32_2 : i32
    %40 = arith.addi %c0_i32_2, %39 : i32
    %c1_i32_3 = arith.constant 1 : i32
    %41 = scf.for %arg6 = %c0_i32_2 to %40 step %c1_i32_3 iter_args(%arg7 = %38) -> (vector<16x128xf32>)  : i32 {
      %c5_i32 = arith.constant 5 : i32
      %57 = arith.addi %9, %c5_i32 : i32
      %c5_i32_14 = arith.constant 5 : i32
      %58 = arith.muli %c5_i32_14, %arg6 : i32
      %59 = arith.addi %57, %58 : i32
      %c0_i32_15 = arith.constant 0 : i32
      %60 = arith.addi %59, %c0_i32_15 : i32
      %61 = arith.index_cast %60 : i32 to index
      %62 = memref.load %arg3[%61] : memref<60xf32, #tpu.memory_space<smem>>
      %c1_i32_16 = arith.constant 1 : i32
      %63 = arith.addi %59, %c1_i32_16 : i32
      %64 = arith.index_cast %63 : i32 to index
      %65 = memref.load %arg3[%64] : memref<60xf32, #tpu.memory_space<smem>>
      %c2_i32_17 = arith.constant 2 : i32
      %66 = arith.addi %59, %c2_i32_17 : i32
      %67 = arith.index_cast %66 : i32 to index
      %68 = memref.load %arg3[%67] : memref<60xf32, #tpu.memory_space<smem>>
      %c3_i32_18 = arith.constant 3 : i32
      %69 = arith.addi %59, %c3_i32_18 : i32
      %70 = arith.index_cast %69 : i32 to index
      %71 = memref.load %arg3[%70] : memref<60xf32, #tpu.memory_space<smem>>
      %c4_i32_19 = arith.constant 4 : i32
      %72 = arith.addi %59, %c4_i32_19 : i32
      %73 = arith.index_cast %72 : i32 to index
      %74 = memref.load %arg3[%73] : memref<60xf32, #tpu.memory_space<smem>>
      %75 = vector.broadcast %62 : f32 to vector<16x128xf32>
      %76 = arith.subf %6, %75 : vector<16x128xf32>
      %77 = vector.broadcast %68 : f32 to vector<16x128xf32>
      %78 = arith.mulf %76, %77 : vector<16x128xf32>
      %79 = vector.broadcast %65 : f32 to vector<16x128xf32>
      %80 = arith.subf %4, %79 : vector<16x128xf32>
      %81 = vector.broadcast %71 : f32 to vector<16x128xf32>
      %82 = arith.mulf %80, %81 : vector<16x128xf32>
      %83 = arith.mulf %78, %78 : vector<16x128xf32>
      %84 = arith.mulf %82, %82 : vector<16x128xf32>
      %85 = arith.addf %83, %84 : vector<16x128xf32>
      %86 = vector.broadcast %74 : f32 to vector<16x128xf32>
      %87 = arith.subf %85, %86 : vector<16x128xf32>
      %88 = arith.minimumf %arg7, %87 : vector<16x128xf32>
      scf.yield %88 : vector<16x128xf32>
    }
    %cst_4 = arith.constant 0.000000e+00 : f32
    %42 = vector.broadcast %cst_4 : f32 to vector<16x128xf32>
    %43 = arith.cmpf ole, %41, %42 : vector<16x128xf32>
    %44 = arith.ori %35, %43 : vector<16x128xi1>
    %cst_5 = arith.constant 1.000000e+00 : f32
    %45 = arith.subf %cst_5, %12 : f32
    %cst_6 = arith.constant 1.000000e+00 : f32
    %46 = vector.broadcast %45 : f32 to vector<16x128xf32>
    %47 = vector.broadcast %cst_6 : f32 to vector<16x128xf32>
    %48 = arith.select %44, %46, %47 : vector<16x128xi1>, vector<16x128xf32>
    %c0 = arith.constant 0 : index
    %c0_7 = arith.constant 0 : index
    %c0_8 = arith.constant 0 : index
    %c0_9 = arith.constant 0 : index
    %49 = vector.load %arg4[%c0, %c0_7, %c0_8, %c0_9] : memref<1x3x16x128xf32, #tpu.memory_space<vmem>>, vector<1x3x16x128xf32>
    %50 = vector.shape_cast %49 : vector<1x3x16x128xf32> to vector<3x16x128xf32>
    %51 = vector.shape_cast %48 : vector<16x128xf32> to vector<1x16x128xf32>
    %52 = vector.broadcast %51 : vector<1x16x128xf32> to vector<3x16x128xf32>
    %53 = arith.mulf %50, %52 : vector<3x16x128xf32>
    %c0_10 = arith.constant 0 : index
    %c0_11 = arith.constant 0 : index
    %c0_12 = arith.constant 0 : index
    %c0_13 = arith.constant 0 : index
    %54 = vector.load %arg5[%c0_10, %c0_11, %c0_12, %c0_13] : memref<1x3x16x128xf32, #tpu.memory_space<vmem>>, vector<1x3x16x128xf32>
    %55 = vector.shape_cast %54 : vector<1x3x16x128xf32> to vector<3x16x128xf32>
    %56 = vector.shape_cast %53 : vector<3x16x128xf32> to vector<1x3x16x128xf32>
    tpu.vector_store %arg5[%c0_10, %c0_11, %c0_12, %c0_13], %56 {strides = array<i32>} : memref<1x3x16x128xf32, #tpu.memory_space<vmem>>, vector<1x3x16x128xf32>,
    return
  }
  func.func @transform_0(%arg0: i32, %arg1: i32, %arg2: memref<2xi32, #tpu.memory_space<smem>>, %arg3: memref<60xf32, #tpu.memory_space<smem>>) -> (i32, i32, i32, i32) {
    %c0_i32 = arith.constant 0 : i32
    %c0_i32_0 = arith.constant 0 : i32
    %c0_i32_1 = arith.constant 0 : i32
    return %arg0, %c0_i32, %arg1, %c0_i32_0 : i32, i32, i32, i32
  }
  func.func @transform_1(%arg0: i32, %arg1: i32, %arg2: memref<2xi32, #tpu.memory_space<smem>>, %arg3: memref<60xf32, #tpu.memory_space<smem>>) -> (i32, i32, i32, i32) {
    %c0_i32 = arith.constant 0 : i32
    %c0_i32_0 = arith.constant 0 : i32
    %c0_i32_1 = arith.constant 0 : i32
    return %arg0, %c0_i32, %arg1, %c0_i32_0 : i32, i32, i32, i32
  }
}

</mosaic_0001>

<bundles_post_ra>
// kernel: tpu_custom_call.1
= control target key start
LH: loop header
LB: loop body
LE: loop exit
PB: predicated region body
PF: predicated region fallthrough
CT: control target
= control target key end

     0   :  { %s695_s18 = smov [#allocation3]   ;;  %s696_s19 = smov [#allocation4]   ;;  %s939_s0 = inlined_call_operand.hbm [shape: s32[2], index: 0, kind: input, shape index: {}]   ;;  %s940_s2 = inlined_call_operand.hbm [shape: f32[2,3,16,128], index: 2, kind: input, shape index: {}]   ;;  %s941_s3 = inlined_call_operand.hbm [shape: f32[2,3,16,128], index: 3, kind: output, shape index: {}]   ;;  %s942_s1 = inlined_call_operand.hbm [shape: f32[60], index: 1, kind: input, shape index: {}]  }
   0x1   :  { %s9_s14 = sshll.u32 %s939_s0, 4  ;;  %s14_s17 = sshll.u32 %s942_s1, 4  ;;  %s10_s14 = int_to_ptr.hbm [resolvable:$true] %s9_s14  ;;  %s15_s17 = int_to_ptr.hbm [resolvable:$true] %s14_s17 }
   0x2   :  { %12 = dma.hbm_to_smem %s10_s14, 16, %s695_s18, [#allocation2] }
   0x3   :  { %17 = dma.hbm_to_smem %s15_s17, 16, %s696_s19, [#allocation2] }
   0x4   :  { %641 = dma.done.wait [#allocation2], 32 }
   0x5   :  { %642 = vsyncadd [#allocation2], 4294967264 }
   0x6   :  { %20 = sfence }
   0x7   :  { %21 = vsyncpa [#allocation6], 0 }
   0x8   :  { %23 = vsyncpa [#allocation6 + $0x1], 0 }
   0x9   :  { %24 = vsyncpa [#allocation7], 0 }
   0xa   :  { %26 = vsyncpa [#allocation7 + $0x1], 0  ;;  %s727_s20 = smov 0   ;;  %s729_s0 = smov 0  }
   0xb   :  { %s731_s21 = smov 0   ;;  %s733_s1 = smov 0  }
   0xc   :  { %s735_s22 = smov 0   ;;  %s737_s23 = smov 0  }
   0xd LB: > { %s393_s24 = sadd.s32 4294967295, %s673_s23   ;;  %s394_s25 = sadd.s32 4294967294, %s673_s23   ;;  %s673_s23 = sphi %s737_s23, %s32_s23   ;;  %s669_s22 = sphi %s735_s22, %s957_s22   ;;  %s665_s1 = sphi %s733_s1, %s956_s1   ;;  %s661_s21 = sphi %s731_s21, %s955_s21   ;;  %s657_s0 = sphi %s729_s0, %s954_s0   ;;  %s653_s20 = sphi %s727_s20, %s953_s20  }
   0xe   : > { %s44_s26 = sadd.s32 1, %s669_s22  ;;  %s53_s27 = sadd.s32 1, %s661_s21 }
   0xf   : > { %p46_p0 = scmp.ge.s32.totalorder %s44_s26, 2  ;;  %p60_p1 = scmp.ne.s32.totalorder %s661_s21, %s657_s0 }
  0x10   : > { %p61_p2 = scmp.eq.s32.totalorder %s673_s23, 0  ;;  %p66_p3 = scmp.ne.s32.totalorder %s657_s0, %s653_s20 }
  0x11   : > { %s959_s26 = smov (%p46_p0, %s44_s26), 0  ;;  %p67_p5 = scmp.eq.s32.totalorder %s393_s24, 0 }
  0x12   : > { %p768_p4 = por %p61_p2, %p60_p1  ;;  %s48_s29 = ssub.s32 %s669_s22, %s959_s26 }
  0x13   : > { %p92_p6 = scmp.eq.s32.totalorder %s393_s24, 1  ;;  %p51_p7 = scmp.eq.s32.totalorder %s48_s29, 0 }
  0x14   : > { %p774_p8 = por %p67_p5, %p66_p3  ;;  %p98_p10 = scmp.eq.s32.totalorder %s394_s25, 1 }
  0x15   : > { %p778_p9 = por %p92_p6, %p60_p1  ;;  %p396_p12 = scmp.ge.s32.totalorder %s673_s23, 2 }
  0x16   : > { %s783_s5 = scalar_select %p51_p7, %s661_s21, %s53_s27  }
  0x17   : > { %p785_p11 = por %p98_p10, %p66_p3  ;;  %p419_p13 = scmp.lt.s32.totalorder %s673_s23, 2 }
  0x18   : > { %s118_s7 = sand.u32 1, %s661_s21   ;;  %s404_s9 = smul.u32 48, %s669_s22 }
  0x19   : > { %s403_s8 = smul.u32 48, %s118_s7  ;;  %p412_p0 = pnand %p419_p13, %p768_p4 }
  0x1a   : > { %s129_s12 = scalar_lea.hbm %s940_s2, %s404_s9  ;;  %p398_p1 = scmp.ge.s32.totalorder %s673_s23, 1 }
  0x1b   : > { %s122_s13 = scalar_lea.vmem [#allocation5], %s403_s8  ;;  %s130_s15 = sshll.u32 %s129_s12, 4  ;;  %s131_s15 = int_to_ptr.hbm [resolvable:$true] %s130_s15 }
  0x1c   : > { %s132_s14 = sshll.u32 %s122_s13, 4  ;;  %s119_s16 = scalar_lea.sflag [#allocation6], %s118_s7  ;;  %s133_s14 = int_to_ptr.vmem [resolvable:$true] %s132_s14 }
  0x1d   : > { %s697_s17 = smov 128   ;;  %s698_s18 = smov 8  }
  0x1e   : > { %414 = dma.hbm_to_vmem [thread:$0]  (!%p412_p0), %s131_s15, 768, %s133_s14, %s119_s16, %s697_s17, %s697_s17, %s698_s18  }
  0x1f   : > { %p140_p2 = scmp.lt.s32.totalorder %s673_s23, 3 }
  0x21   : > { %p141_p3 = pnand %p398_p1, %p140_p2 }
  0x22   : > { %s801_s19 = sand.u32 (!%p141_p3), 1, %s657_s0  }
  0x23   : > { %144 = sbr.rel (%p141_p3) target bundleno = 102 (0x66), region = 24  ;;  %s147_s25 = scalar_lea.sflag (!%p141_p3), [#allocation6], %s801_s19 }
  0x24   : > { %s405_s24 = smul.u32 (!%p141_p3), 48, %s801_s19 }
  0x26   : > { %s807_s27 = scalar_lea.vmem (!%p141_p3), [#allocation5], %s405_s24 }
  0x28   : > { %644 = dma.done.wait (%p774_p8), %s147_s25, 768  }
  0x29   : > { %646 = vsyncadd (%p774_p8), %s147_s25, 4294966528  ;;  %v173_v0 = vlaneseq  ;;  %s814_s28 = smul.u32 30, %s665_s1  ;;  %s817_s29 = sld [smem:[#allocation3 + %s665_s1]]  ;;  %v687_v14 = vmov inf   ;;  %v691_v15 = vmov inf  }
  0x2a   : > { %s860_s15 = scalar_lea.vmem [#allocation8], %s405_s24 }
  0x2b   : > { %v174_v1 = vshrl.u32 %v173_v0, 7  ;;  %s820_s7 = sld [smem:[#allocation4 + %s814_s28]]  ;;  %s186_s8 = sadd.s32 1, %s814_s28  ;;  %v182_v3 = vand.u32 127, %v173_v0 }
  0x2c   : > { %s187_s9 = sld [smem:[#allocation4 + %s186_s8]]  ;;  %s188_s10 = sadd.s32 2, %s814_s28 }
  0x2d   : > { %v175_v2 = vadd.s32 8, %v174_v1  ;;  %s189_s30 = sld [smem:[#allocation4 + %s188_s10]]  ;;  %s190_s11 = sadd.s32 3, %s814_s28  ;;  %v826_v4 = vcvt.s32.f32 %v174_v1  ;;  %v830_v6 = vcvt.s32.f32 %v182_v3 }
  0x2e   : > { %s191_s12 = sld [smem:[#allocation4 + %s190_s11]]  ;;  %s192_s13 = sadd.s32 4, %s814_s28 }
  0x2f   : > { %v828_v5 = vcvt.s32.f32 %v175_v2  ;;  %s193_s14 = sld [smem:[#allocation4 + %s192_s13]]  ;;  %p399_p4 = scmp.le.s32.totalorder %s817_s29, 0 }
  0x30   : > { %s863_s16 = smov (!%p399_p4), 0  }
  0x32   : > { %v194_v7 = vstv %s187_s9 }
  0x33   : > { %vm195_vm0 = vcmp.ge.f32.partialorder %v826_v4, %v194_v7  ;;  %vm196_vm1 = vcmp.ge.f32.partialorder %v828_v5, %v194_v7  ;;  %v197_v8 = vstv %s189_s30 }
  0x34   : > { %vm198_vm2 = vcmp.le.f32.partialorder %v826_v4, %v197_v8  ;;  %vm199_vm3 = vcmp.le.f32.partialorder %v828_v5, %v197_v8  ;;  %v202_v9 = vstv %s191_s12 }
  0x35   : > { %vm200_vm4 = vmand %vm195_vm0, %vm198_vm2  ;;  %vm203_vm5 = vcmp.ge.f32.partialorder %v830_v6, %v202_v9  ;;  %v206_v10 = vstv %s193_s14 }
  0x36   : > { %vm201_vm6 = vmand %vm196_vm1, %vm199_vm3  ;;  %vm838_vm7 = vcmp.le.f32.partialorder %v830_v6, %v206_v10  ;;  %354 = sbr.rel (%p399_p4) target bundleno = 84 (0x54), region = 70 }
  0x37   : > { %vm842_vm8 = vmand %vm200_vm4, %vm203_vm5 }
  0x38   : > { %vm846_vm9 = vmand %vm201_vm6, %vm203_vm5 }
  0x39   : > { %vm208_vm10 = vmand %vm842_vm8, %vm838_vm7 }
  0x3a   : > { %vm209_vm11 = vmand %vm846_vm9, %vm838_vm7 }
  0x3b   : > { %v675_v16 = vmov inf   ;;  %v679_v17 = vmov inf  }
  0x3c LB: >> { %s219_s17 = sadd.s32 5, %s814_s28  ;;  %s220_s18 = smul.u32 5, %s685_s16  ;;  %s685_s16 = sphi %s863_s16, %s214_s16   ;;  %v681_v17 = vphi %v679_v17, %v680_v17   ;;  %v677_v16 = vphi %v675_v16, %v676_v16  }
  0x3d   : >> { %s214_s16 = sadd.s32 1, %s685_s16  }
  0x3e   : >> { %s221_s24 = sadd.s32 %s220_s18, %s219_s17  ;;  %p213_p5 = scmp.ge.s32.totalorder %s214_s16, %s817_s29 }
  0x3f   : >> { %s222_s25 = sld [smem:[#allocation4 + %s221_s24]]  ;;  %s223_s8 = sadd.s32 1, %s221_s24 }
  0x40   : >> { %s224_s9 = sld [smem:[#allocation4 + %s223_s8]]  ;;  %s225_s10 = sadd.s32 2, %s221_s24 }
  0x41   : >> { %s226_s30 = sld [smem:[#allocation4 + %s225_s10]]  ;;  %s227_s11 = sadd.s32 3, %s221_s24 }
  0x42   : >> { %s228_s12 = sld [smem:[#allocation4 + %s227_s11]]  ;;  %s229_s13 = sadd.s32 4, %s221_s24 }
  0x43   : >> { %s230_s14 = sld [smem:[#allocation4 + %s229_s13]] }
  0x45   : >> { %v231_v18 = vstv %s222_s25 }
  0x46   : >> { %v232_v19 = vsub.f32 %v830_v6, %v231_v18  ;;  %v235_v20 = vstv %s224_s9 }
  0x47   : >> { %v233_v21 = vstv %s226_s30  ;;  %v236_v22 = vsub.f32 %v826_v4, %v235_v20  ;;  %v237_v23 = vsub.f32 %v828_v5, %v235_v20 }
  0x48   : >> { %v234_v24 = vmul.f32 %v233_v21, %v232_v19  ;;  %v238_v25 = vstv %s228_s12 }
  0x49   : >> { %v239_v26 = vmul.f32 %v238_v25, %v236_v22  ;;  %v240_v27 = vmul.f32 %v238_v25, %v237_v23  ;;  %v246_v31 = vstv %s230_s14 }
  0x4a   : >> { %v241_v28 = vmul.f32 %v234_v24, %v234_v24 }
  0x4b   : >> { %v242_v29 = vmul.f32 %v239_v26, %v239_v26  ;;  %v243_v30 = vmul.f32 %v240_v27, %v240_v27 }
  0x4d   : >> { %v244_v32 = vadd.f32 %v242_v29, %v241_v28  ;;  %v245_v33 = vadd.f32 %v243_v30, %v241_v28 }
  0x4f   : >> { %v247_v34 = vsub.f32 %v244_v32, %v246_v31  ;;  %v248_v35 = vsub.f32 %v245_v33, %v246_v31  ;;  %216 = sbr.rel (!%p213_p5) target bundleno = 60 (0x3c), region = 76 }
  0x51   : >> { %v249_v36 = vmin.f32 %v681_v17, %v247_v34   ;;  %v250_v37 = vmin.f32 %v677_v16, %v248_v35  }
  0x53   : >> { %v676_v16 = vmov %v250_v37   ;;  %v680_v17 = vmov %v249_v36   ;;  %v688_v14 = vmov (%p213_p5), %v250_v37   ;;  %v692_v15 = vmov (%p213_p5), %v249_v36  }
  0x54 PF: > { %vm251_vm12 = vcmp.le.f32.partialorder %v693_v15, 0.0  ;;  %s255_s17 = ssub.f32 1.0, %s820_s7  ;;  %v259_v38 = vld [vmem:[%s807_s27] sm:$0xff]  ;;  %vm252_vm13 = vcmp.le.f32.partialorder %v689_v14, 0.0  ;;  %v260_v39 = vld [vmem:[%s807_s27 + $0x8] sm:$0xff]  ;;  %v261_v40 = vld [vmem:[%s807_s27 + $0x10] sm:$0xff]  ;;  %v693_v15 = vphi %v691_v15, %v692_v15   ;;  %v689_v14 = vphi %v687_v14, %v688_v14  }
  0x55   : > { %vm253_vm14 = vmor %vm208_vm10, %vm251_vm12  ;;  %s406_s28 = smul.u32 48, %s665_s1  ;;  %v262_v42 = vld [vmem:[%s807_s27 + $0x18] sm:$0xff]  ;;  %v263_v45 = vld [vmem:[%s807_s27 + $0x20] sm:$0xff]  ;;  %s292_s1 = sshll.u32 %s860_s15, 4  ;;  %s293_s1 = int_to_ptr.vmem [resolvable:$true] %s292_s1 }
  0x56   : > { %v256_v41 = vstv %s255_s17  ;;  %vm254_vm15 = vmor %vm209_vm11, %vm252_vm13  ;;  %v264_v49 = vld [vmem:[%s807_s27 + $0x28] sm:$0xff]  ;;  %s278_s24 = scalar_lea.sflag [#allocation7], %s801_s19  ;;  %s589_s10 = scalar_lea.hbm %s941_s3, 96 }
  0x57   : > { %v257_v43 = vsel %vm253_vm14, %v256_v41, 1.0  ;;  %v258_v44 = vsel %vm254_vm15, %v256_v41, 1.0  ;;  %s291_s16 = scalar_lea.hbm %s941_s3, %s406_s28 }
  0x58   : > { %v265_v46 = vmul.f32 %v259_v38, %v257_v43  ;;  %v266_v47 = vmul.f32 %v260_v39, %v258_v44  ;;  %v267_v48 = vmul.f32 %v261_v40, %v257_v43  ;;  %v268_v50 = vmul.f32 %v262_v42, %v258_v44  ;;  %s294_s18 = sshll.u32 %s291_s16, 4  ;;  %s295_s18 = int_to_ptr.hbm [resolvable:$true] %s294_s18 }
  0x59   : > { %v269_v51 = vmul.f32 %v263_v45, %v257_v43  ;;  %v270_v52 = vmul.f32 %v264_v49, %v258_v44  ;;  %s583_s25 = sshra.s32 %s295_s18, 4  ;;  %s584_s25 = int_to_ptr.hbm [resolvable:$true] %s583_s25 }
  0x5a   : > { %271 = vst [vmem:[%s860_s15] sm:$0xff] %v265_v46  ;;  %s585_s8 = scalar_lea.hbm %s584_s25, 48  ;;  %p590_p10 = scmp.lt.s32.totalorder %s584_s25, %s941_s3 }
  0x5b   : > { %272 = vst [vmem:[%s860_s15 + $0x8] sm:$0xff] %v266_v47  ;;  %p586_p6 = scmp.ne.s32.totalorder %s584_s25, %s585_s8  ;;  %p591_p13 = scmp.lt.s32.totalorder %s589_s10, %s585_s8 }
  0x5c   : > { %273 = vst [vmem:[%s860_s15 + $0x10] sm:$0xff] %v267_v48 }
  0x5d   : > { %274 = vst [vmem:[%s860_s15 + $0x18] sm:$0xff] %v268_v50  ;;  %p587_p7 = pnand %p586_p6, %p778_p9  ;;  %p592_p0 = por %p591_p13, %p590_p10 }
  0x5e   : > { %275 = vst [vmem:[%s860_s15 + $0x20] sm:$0xff] %v269_v51 }
  0x5f   : > { %276 = vst [vmem:[%s860_s15 + $0x28] sm:$0xff] %v270_v52  ;;  %p588_p8 = pneg %p587_p7 }
  0x61   : > { %p593_p1 = pnand %p592_p0, %p588_p8 }
  0x63   : > { %596 = shalt.err (!%p593_p1)
}
  0x64   : > { %s699_s19 = smov 128   ;;  %s700_s15 = smov 8  }
  0x65   : > { %409 = dma.vmem_to_hbm [thread:$0]  (%p778_p9), %s293_s1, 768, %s295_s18, %s278_s24, %s699_s19, %s699_s19, %s700_s15  }
  0x66 PF: > { %s309_s12 = sand.u32 1, %s653_s20   ;;  %p416_p2 = pnand %p396_p12, %p785_p11 }
  0x67   : > { %s310_s13 = scalar_lea.sflag [#allocation7], %s309_s12 }
  0x68   : > { %p417_p3 = pneg %p416_p2 }
  0x6a   : > { %648 = dma.done.wait (%p417_p3), %s310_s13, 768  }
  0x6b   : > { %650 = vsyncadd (%p417_p3), %s310_s13, 4294966528  ;;  %s32_s23 = sadd.s32 1, %s673_s23   ;;  %s953_s20 = smov %s657_s0 }
  0x6c   : > { %p29_p4 = scmp.ge.s32.totalorder %s32_s23, 4   ;;  %s954_s0 = smov %s661_s21 }
  0x6d   : > { %s955_s21 = smov %s783_s5  ;;  %s956_s1 = smov %s669_s22 }
  0x6e   : > { %s957_s22 = smov %s959_s26  ;;  %31 = sbr.rel (!%p29_p4) target bundleno = 13 (0xd), region = 87 }
  0x73   :  { %316 = vsyncpa [#allocation6], 1 }
  0x74   :  { %318 = vsyncpa [#allocation6 + $0x1], 1 }
  0x75   :  { %319 = vsyncpa [#allocation7], 1 }
  0x76   :  { %321 = vsyncpa [#allocation7 + $0x1], 1 }

</bundles_post_ra>
